<compile_context>
chip_gen: v6e
topology: v6e:2x2x1
jax: 0.10.0
libtpu: 0.0.40
codegen_flags: <defaults>
</compile_context>

<pallas_src>
import math
from typing import NamedTuple

import jax
import jax.numpy as jnp
from jax.experimental import pallas as pl
from jax.experimental.pallas import tpu as pltpu

# Small synthetic hyper-parameters (SEQ_LEN = 50 is fixed by the module:
# linear in_features = embedding_dim * 50).
NUM_EMBEDDINGS = 32
EMBEDDING_DIM = 16
NUM_CLASSES = 8
SEQ_LEN = 50
BATCH = 2

LANES = 128
SUBLANES = 8


class FoldedOLP(NamedTuple):
    """Pre-folded parameters (computed once per weight set)."""
    p: jax.Array        # (K, Cpad)   table folded into the linear weight
    bias: jax.Array     # (1, Cpad)   float32
    vcol: jax.Array     # (1, K)      int32, vcol[s*V + v] = v
    vocab: int          # V
    seq_len: int        # S
    num_classes: int    # C (unpadded)


def _olp_kernel(code_ref, vcol_ref, p_ref, bias_ref, o_ref):
    """Fused forward: one_hot(token ids) @ P + bias.

    code_ref : (TB, K)   int8/int16, code[b, s*V + v] = idx[b, s]  (-1 if OOB)
    vcol_ref : (1, K)    int32,      vcol[s*V + v]    = v
    p_ref    : (K, Cpad) param dtype (bf16/f32), folded weights
    bias_ref : (1, Cpad) f32
    o_ref    : (TB, Cpad) f32        (lane-dense, Cpad multiple of 128)
    """
    # One-hot gather matrix built directly in the fused (seq, vocab) layout:
    # the per-token id (repeated across its V-wide column block) is compared
    # against the column's vocab id.  (1, K) vcol broadcasts over sublanes for
    # free; no per-row iota is materialized.  Out-of-range ids (-1) match
    # nothing, so those rows contribute only the bias.
    onehot = (code_ref[...].astype(jnp.int32) == vcol_ref[...]).astype(p_ref.dtype)
    o_ref[...] = (
        jnp.dot(onehot, p_ref[...], preferred_element_type=jnp.float32)
        + bias_ref[...]
    )


def fold_params(table, weight, bias, *, param_dtype=jnp.bfloat16):
    """Fold embedding table + linear weight into P.  Call once per weight set.

    table  : (V, D)   embedding table (row padding_idx=0 zeroed, as nn.Embedding)
    weight : (C, S*D) PyTorch nn.Linear weight (out_features, in_features)
    bias   : (C,)
    """
    V, D = table.shape
    C, in_features = weight.shape
    assert in_features % D == 0, "linear in_features must be a multiple of D"
    S = in_features // D
    K = S * V
    c_pad = pl.cdiv(C, LANES) * LANES               # lane-dense output width

    # P[s*V + v, c] = sum_d table[v, d] * weight[c, s*D + d]   (built in f32)
    w3 = weight.astype(jnp.float32).reshape(C, S, D)
    p = jnp.einsum("vd,csd->svc", table.astype(jnp.float32), w3)    # (S, V, C)
    p_flat = jnp.pad(p.reshape(K, C), ((0, 0), (0, c_pad - C)))
    p_flat = p_flat.astype(param_dtype)                             # (K, Cpad)
    bias_pad = jnp.pad(bias.astype(jnp.float32), (0, c_pad - C)).reshape(1, c_pad)

    # Column -> vocab-id map along the fused (seq, vocab) axis: vcol[k] = k % V.
    vcol = jnp.tile(jnp.arange(V, dtype=jnp.int32), S).reshape(1, K)

    return FoldedOLP(p=p_flat, bias=bias_pad, vcol=vcol,
                     vocab=V, seq_len=S, num_classes=C)


def one_layer_perceptron_fwd(idx, folded, *, batch_tile=256, min_grid_steps=2):
    """Forward pass of OneLayerPerceptron.

    idx    : (B, S) integer token ids
    folded : FoldedOLP from fold_params
    returns: (B, C) float32
    """
    B, S = idx.shape
    assert S == folded.seq_len, "sequence length must match the folded weights"
    V = folded.vocab
    K = S * V
    c_pad = folded.p.shape[1]

    # ---- Index plumbing (cheap, O(B*K) int8 bytes) --------------------------
    # Sanitize ids so out-of-range tokens contribute bias only, then narrow the
    # dtype (ids < V, so int8 for V <= 127) and repeat each id across its
    # V-wide column block on the fused (seq, vocab) axis.
    code_dtype = (jnp.int8 if V <= 127 else
                  jnp.int16 if V <= 32767 else jnp.int32)
    ids = idx.astype(jnp.int32)
    ids = jnp.where((ids >= 0) & (ids < V), ids, -1)
    code = jnp.repeat(ids.astype(code_dtype), V, axis=1)             # (B, K)

    # ---- Batch tiling --------------------------------------------------------
    tb = min(B, batch_tile)
    # Engage both TensorCores on dual-TC chips (v7x): if the whole batch would
    # be a single grid step but can be split into sublane-aligned tiles, split.
    if pl.cdiv(B, tb) < min_grid_steps and B >= SUBLANES * min_grid_steps:
        tb = pl.cdiv(pl.cdiv(B, min_grid_steps), SUBLANES) * SUBLANES
    grid = (pl.cdiv(B, tb),)

    out_padded = pl.pallas_call(
        _olp_kernel,
        out_shape=jax.ShapeDtypeStruct((B, c_pad), jnp.float32),
        grid_spec=pltpu.PrefetchScalarGridSpec(
            num_scalar_prefetch=0,
            grid=grid,
            in_specs=[
                pl.BlockSpec((tb, K), lambda i: (i, 0)),       # token ids (narrow)
                pl.BlockSpec((1, K), lambda i: (0, 0)),        # column vocab ids
                pl.BlockSpec((K, c_pad), lambda i: (0, 0)),    # folded weights
                pl.BlockSpec((1, c_pad), lambda i: (0, 0)),    # bias
            ],
            out_specs=pl.BlockSpec((tb, c_pad), lambda i: (i, 0)),
        ),
        compiler_params=pltpu.CompilerParams(
            dimension_semantics=("parallel",),   # batch axis -> both TCs on v7x
        ),
    )(code, folded.vcol, folded.p, folded.bias)

    return out_padded[:, :folded.num_classes]


def _reference(idx, table, weight, bias):
    """Pure-JAX reference: embedding gather -> flatten -> linear (f32)."""
    B = idx.shape[0]
    emb = jnp.take(table, idx, axis=0).reshape(B, -1)
    return emb @ weight.T + bias


if __name__ == "__main__":
    key = jax.random.PRNGKey(0)
    k_idx, k_idx2, k_emb, k_w, k_b = jax.random.split(key, 5)

    # nn.Embedding: N(0, 1) init, padding_idx row zeroed.
    table = jax.random.normal(k_emb, (NUM_EMBEDDINGS, EMBEDDING_DIM), dtype=jnp.float32)
    table = table.at[0].set(0.0)

    # nn.Linear: U(-1/sqrt(in), 1/sqrt(in)) init; PyTorch stores weight as (out, in).
    in_features = SEQ_LEN * EMBEDDING_DIM
    bound = 1.0 / math.sqrt(in_features)
    w = jax.random.uniform(k_w, (NUM_CLASSES, in_features), jnp.float32, -bound, bound)
    b = jax.random.uniform(k_b, (NUM_CLASSES,), jnp.float32, -bound, bound)

    # ---- Test 1: toy batch, f32 folded params, tight tolerance ---------------
    idx = jax.random.randint(k_idx, (BATCH, SEQ_LEN), 0, NUM_EMBEDDINGS, dtype=jnp.int32)
    folded_f32 = fold_params(table, w, b, param_dtype=jnp.float32)
    out = one_layer_perceptron_fwd(idx, folded_f32)
    out = jax.block_until_ready(out)
    ref = _reference(idx, table, w, b)
    assert out.shape == (BATCH, NUM_CLASSES)
    assert jnp.allclose(out, ref, atol=1e-4, rtol=1e-4), "f32 path mismatch vs reference"

    # ---- Test 2: larger batch (multi-step grid / megacore path), bf16 params -
    B2 = 256
    idx2 = jax.random.randint(k_idx2, (B2, SEQ_LEN), 0, NUM_EMBEDDINGS, dtype=jnp.int32)
    folded_bf16 = fold_params(table, w, b)          # default param_dtype=bfloat16
    out2 = one_layer_perceptron_fwd(idx2, folded_bf16)   # tb=128 -> grid=(2,)
    out2 = jax.block_until_ready(out2)
    ref2 = _reference(idx2, table, w, b)
    assert out2.shape == (B2, NUM_CLASSES)
    assert jnp.allclose(out2, ref2, atol=2e-2, rtol=2e-2), "bf16 path mismatch vs reference"

    print("KERNEL_OK")
</pallas_src>

<mosaic_0001>
module attributes {stable_mosaic.version = 11 : i64} {
  func.func @_olp_kernel(%arg0: i32, %arg1: memref<2x1600xi8, #tpu.memory_space<vmem>>, %arg2: memref<1x1600xi32, #tpu.memory_space<vmem>>, %arg3: memref<1600x128xf32, #tpu.memory_space<vmem>>, %arg4: memref<1x128xf32, #tpu.memory_space<vmem>>, %arg5: memref<2x128xf32, #tpu.memory_space<vmem>>) attributes {dimension_semantics = [#tpu.dimension_semantics<parallel>], iteration_bounds = array<i64: 1>, scalar_prefetch = 0 : i64, scratch_operands = 0 : i64, tpu.core_type = #tpu.core_type<tc>, window_params = [{transform_indices = @transform_0, window_bounds = array<i64: 2, 1600>}, {pipeline_mode = #tpu.pipeline_mode<synchronous>, transform_indices = @transform_1, window_bounds = array<i64: 1, 1600>}, {pipeline_mode = #tpu.pipeline_mode<synchronous>, transform_indices = @transform_2, window_bounds = array<i64: 1600, 128>}, {pipeline_mode = #tpu.pipeline_mode<synchronous>, transform_indices = @transform_3, window_bounds = array<i64: 1, 128>}, {transform_indices = @transform_4, window_bounds = array<i64: 2, 128>}]} {
    %c0 = arith.constant 0 : index
    %c0_0 = arith.constant 0 : index
    %0 = vector.load %arg1[%c0, %c0_0] : memref<2x1600xi8, #tpu.memory_space<vmem>>, vector<2x1600xi8>
    %1 = arith.extsi %0 : vector<2x1600xi8> to vector<2x1600xi32>
    %c0_1 = arith.constant 0 : index
    %c0_2 = arith.constant 0 : index
    %2 = vector.load %arg2[%c0_1, %c0_2] : memref<1x1600xi32, #tpu.memory_space<vmem>>, vector<1x1600xi32>
    %3 = vector.broadcast %2 : vector<1x1600xi32> to vector<2x1600xi32>
    %4 = arith.cmpi eq, %1, %3 : vector<2x1600xi32>
    %5 = arith.extui %4 : vector<2x1600xi1> to vector<2x1600xi32>
    %6 = arith.sitofp %5 : vector<2x1600xi32> to vector<2x1600xf32>
    %c0_3 = arith.constant 0 : index
    %c0_4 = arith.constant 0 : index
    %7 = vector.load %arg3[%c0_3, %c0_4] : memref<1600x128xf32, #tpu.memory_space<vmem>>, vector<1600x128xf32>
    %cst = arith.constant dense<0.000000e+00> : vector<2x128xf32>
    %8 = tpu.matmul %6, %7, %cst {dimension_numbers = #tpu.dot_dimension_numbers<[1], [0], [0], [1], [0, 0, 1, 1], [], []>} : vector<2x1600xf32>, vector<1600x128xf32>, vector<2x128xf32> -> vector<2x128xf32>
    %c0_5 = arith.constant 0 : index
    %c0_6 = arith.constant 0 : index
    %9 = vector.load %arg4[%c0_5, %c0_6] : memref<1x128xf32, #tpu.memory_space<vmem>>, vector<1x128xf32>
    %10 = vector.broadcast %9 : vector<1x128xf32> to vector<2x128xf32>
    %11 = arith.addf %8, %10 : vector<2x128xf32>
    %c0_7 = arith.constant 0 : index
    %c0_8 = arith.constant 0 : index
    %12 = vector.load %arg5[%c0_7, %c0_8] : memref<2x128xf32, #tpu.memory_space<vmem>>, vector<2x128xf32>
    tpu.vector_store %arg5[%c0_7, %c0_8], %11 {strides = array<i32>} : memref<2x128xf32, #tpu.memory_space<vmem>>, vector<2x128xf32>,
    return
  }
  func.func @transform_0(%arg0: i32) -> (i32, i32) {
    %c0_i32 = arith.constant 0 : i32
    %c0_i32_0 = arith.constant 0 : i32
    return %arg0, %c0_i32 : i32, i32
  }
  func.func @transform_1(%arg0: i32) -> (i32, i32) {
    %c0_i32 = arith.constant 0 : i32
    %c0_i32_0 = arith.constant 0 : i32
    %c0_i32_1 = arith.constant 0 : i32
    return %c0_i32, %c0_i32_0 : i32, i32
  }
  func.func @transform_2(%arg0: i32) -> (i32, i32) {
    %c0_i32 = arith.constant 0 : i32
    %c0_i32_0 = arith.constant 0 : i32
    %c0_i32_1 = arith.constant 0 : i32
    return %c0_i32, %c0_i32_0 : i32, i32
  }
  func.func @transform_3(%arg0: i32) -> (i32, i32) {
    %c0_i32 = arith.constant 0 : i32
    %c0_i32_0 = arith.constant 0 : i32
    %c0_i32_1 = arith.constant 0 : i32
    return %c0_i32, %c0_i32_0 : i32, i32
  }
  func.func @transform_4(%arg0: i32) -> (i32, i32) {
    %c0_i32 = arith.constant 0 : i32
    %c0_i32_0 = arith.constant 0 : i32
    return %arg0, %c0_i32 : i32, i32
  }
}

</mosaic_0001>

<bundles_post_ra>
// kernel: tpu_custom_call.1
= control target key start
LH: loop header
LB: loop body
LE: loop exit
PB: predicated region body
PF: predicated region fallthrough
CT: control target
= control target key end

     0   :  { %9 = vsyncpa [#allocation3], 0  ;;  %s1424_s0 = inlined_call_operand.hbm [shape: s8[2,1600], index: 0, kind: input, shape index: {}]   ;;  %s1425_s1 = inlined_call_operand.hbm [shape: s32[1,1600], index: 1, kind: input, shape index: {}]   ;;  %s1426_s2 = inlined_call_operand.hbm [shape: f32[1600,128], index: 2, kind: input, shape index: {}]   ;;  %s1427_s3 = inlined_call_operand.vmem [shape: f32[1,128], index: 3, kind: input, shape index: {}]   ;;  %s1428_s4 = inlined_call_operand.hbm [shape: f32[2,128], index: 4, kind: output, shape index: {}]  }
   0x1   :  { %10 = vsyncpa [#allocation6], 0 }
   0x2   :  { %11 = vsyncpa [#allocation4], 0  ;;  %s1229_s15 = smov [#allocation5]   ;;  %s1230_s17 = smov [#allocation2]  }
   0x3   :  { %s28_s16 = sshll.u32 %s1229_s15, 4  ;;  %s18_s18 = sshll.u32 %s1230_s17, 4  ;;  %s29_s16 = int_to_ptr.vmem [resolvable:$true] %s28_s16  ;;  %s19_s18 = int_to_ptr.vmem [resolvable:$true] %s18_s18 }
   0x4   :  { %s1151_s19 = scalar_lea.vmem %s29_s16, 208  ;;  %s1155_s20 = scalar_lea.vmem %s29_s16, 224 }
   0x5   :  { %p1152_p0 = scmp.ne.s32.totalorder %s29_s16, %s1151_s19  ;;  %p1156_p1 = scmp.lt.s32.totalorder %s29_s16, %s29_s16 }
   0x6   :  { %p1157_p2 = scmp.lt.s32.totalorder %s1155_s20, %s1151_s19 }
   0x8   :  { %p1158_p3 = por %p1157_p2, %p1156_p1 }
   0xa   :  { %p1159_p4 = pnand %p1158_p3, %p1152_p0 }
   0xc   :  { %1162 = shalt.err (!%p1159_p4)
}
   0xd   :  { %31 = dma.hbm_to_vmem [thread:$0]  %s1425_s1, 208, %s29_s16, [#allocation6]  }
   0xe   :  { %s1171_s23 = scalar_lea.vmem %s19_s18, 208  ;;  %s1175_s24 = scalar_lea.vmem %s19_s18, 224 }
   0xf   :  { %p1172_p5 = scmp.ne.s32.totalorder %s19_s18, %s1171_s23  ;;  %p1176_p6 = scmp.lt.s32.totalorder %s19_s18, %s19_s18 }
  0x10   :  { %p1177_p7 = scmp.lt.s32.totalorder %s1175_s24, %s1171_s23 }
  0x12   :  { %p1178_p8 = por %p1177_p7, %p1176_p6 }
  0x14   :  { %p1179_p9 = pnand %p1178_p8, %p1172_p5 }
  0x16   :  { %1182 = shalt.err (!%p1179_p9)
}
  0x17   :  { %21 = dma.hbm_to_vmem [thread:$0]  %s1424_s0, 208, %s19_s18, [#allocation3]  }
  0x18   :  { %s1231_s27 = smov [#allocation7]  }
  0x19   :  { %s37_s28 = sshll.u32 %s1231_s27, 4  ;;  %s38_s28 = int_to_ptr.vmem [resolvable:$true] %s37_s28 }
  0x1a   :  { %s1191_s29 = scalar_lea.vmem %s38_s28, 25600  ;;  %p1196_p11 = scmp.lt.s32.totalorder %s38_s28, %s38_s28 }
  0x1b   :  { %p1192_p10 = scmp.ne.s32.totalorder %s38_s28, %s1191_s29  ;;  %p1197_p12 = scmp.lt.s32.totalorder %s1191_s29, %s1191_s29 }
  0x1d   :  { %p1198_p13 = por %p1197_p12, %p1196_p11 }
  0x1f   :  { %p1199_p0 = pnand %p1198_p13, %p1192_p10 }
  0x21   :  { %1202 = shalt.err (!%p1199_p0)
}
  0x22   :  { %s1232_s1 = smov 128   ;;  %s1233_s30 = smov 8  }
  0x23   :  { %43 = dma.hbm_to_vmem [thread:$0]  %s1426_s2, 25600, %s38_s28, [#allocation6], %s1232_s1, %s1232_s1, %s1233_s30  }
  0x24   :  { %1223 = dma.done.wait [#allocation3], 208  }
  0x25   :  { %1224 = vsyncadd [#allocation3], 4294967088 }
  0x26   :  { %1225 = dma.done.wait [#allocation6], 25808  }
  0x27   :  { %1226 = vsyncadd [#allocation6], 4294941488  ;;  %v176_v0 = vld [vmem:[#allocation7 + $0xf8] sm:$0xff]  ;;  %v175_v2 = vld [vmem:[#allocation7 + $0xf0] sm:$0xff]  ;;  %v66_v23 = vlaneseq  ;;  %vm1236_vm6 = vmmov 0   ;;  %vm371_vm8 = vcmask 523264  }
  0x28   :  { %v160_v1 = vld [vmem:[#allocation7 + $0x78] sm:$0xff]  ;;  %896 = vmatprep.subr.mxu0 %v176_v0  ;;  %v159_v4 = vld [vmem:[#allocation7 + $0x70] sm:$0xff]  ;;  %v174_v6 = vld [vmem:[#allocation7 + $0xe8] sm:$0xff]  ;;  %s1237_s7 = smov [#allocation8]  }
  0x29   :  { %v208_v3 = vld [vmem:[#allocation7 + $0x1f8] sm:$0xff]  ;;  %897 = vmatpush3.msra.mxu0 %v160_v1  ;;  %v207_v7 = vld [vmem:[#allocation7 + $0x1f0] sm:$0xff]  ;;  %v158_v8 = vld [vmem:[#allocation7 + $0x68] sm:$0xff]  ;;  %v1272_v32 = vshrl.u32 %v66_v23, 7 }
  0x2a   :  { %v192_v5 = vld [vmem:[#allocation7 + $0x178] sm:$0xff]  ;;  %931 = vmatprep.subr.mxu1 %v208_v3  ;;  %898 = vmatprep.subr.mxu0 %v175_v2  ;;  %v191_v9 = vld [vmem:[#allocation7 + $0x170] sm:$0xff]  ;;  %v206_v10 = vld [vmem:[#allocation7 + $0x1e8] sm:$0xff] }
  0x2b   :  { %932 = vmatpush3.msra.mxu1 %v192_v5  ;;  %899 = vmatpush3.msra.mxu0 %v159_v4  ;;  %v173_v11 = vld [vmem:[#allocation7 + $0xe0] sm:$0xff]  ;;  %v190_v12 = vld [vmem:[#allocation7 + $0x168] sm:$0xff]  ;;  %v172_v15 = vld [vmem:[#allocation7 + $0xd8] sm:$0xff]  ;;  %v68_v41 = vsub.s32 0, %v1272_v32  ;;  %v72_v42 = vsub.s32 1, %v1272_v32  ;;  %v76_v45 = vsub.s32 2, %v1272_v32 }
  0x2c   :  { %933 = vmatprep.subr.mxu1 %v207_v7  ;;  %900 = vmatprep.subr.mxu0 %v174_v6  ;;  %v157_v13 = vld [vmem:[#allocation7 + $0x60] sm:$0xff]  ;;  %v156_v17 = vld [vmem:[#allocation7 + $0x58] sm:$0xff]  ;;  %v171_v19 = vld [vmem:[#allocation7 + $0xd0] sm:$0xff]  ;;  %v80_v46 = vsub.s32 3, %v1272_v32 }
  0x2d   :  { %934 = vmatpush3.msra.mxu1 %v191_v9  ;;  %v205_v14 = vld [vmem:[#allocation7 + $0x1e0] sm:$0xff]  ;;  %901 = vmatpush3.msra.mxu0 %v158_v8  ;;  %v204_v18 = vld [vmem:[#allocation7 + $0x1d8] sm:$0xff]  ;;  %v155_v21 = vld [vmem:[#allocation7 + $0x50] sm:$0xff] }
  0x2e   :  { %935 = vmatprep.subr.mxu1 %v206_v10  ;;  %v189_v16 = vld [vmem:[#allocation7 + $0x160] sm:$0xff]  ;;  %902 = vmatprep.subr.mxu0 %v173_v11  ;;  %v188_v20 = vld [vmem:[#allocation7 + $0x158] sm:$0xff]  ;;  %v203_v22 = vld [vmem:[#allocation7 + $0x1d0] sm:$0xff]  ;;  %v1234_v10 = vmov 0.0  }
  0x2f   :  { %936 = vmatpush3.msra.mxu1 %v190_v12  ;;  %903 = vmatpush3.msra.mxu0 %v157_v13  ;;  %v170_v24 = vld [vmem:[#allocation7 + $0xc8] sm:$0xff]  ;;  %v187_v25 = vld [vmem:[#allocation7 + $0x150] sm:$0xff]  ;;  %v169_v28 = vld [vmem:[#allocation7 + $0xc0] sm:$0xff] }
  0x30   :  { %937 = vmatprep.subr.mxu1 %v205_v14  ;;  %904 = vmatprep.subr.mxu0 %v172_v15  ;;  %v154_v26 = vld [vmem:[#allocation7 + $0x48] sm:$0xff]  ;;  %v153_v30 = vld [vmem:[#allocation7 + $0x40] sm:$0xff]  ;;  %v168_v33 = vld [vmem:[#allocation7 + $0xb8] sm:$0xff] }
  0x31   :  { %938 = vmatpush3.msra.mxu1 %v189_v16  ;;  %905 = vmatpush3.msra.mxu0 %v156_v17  ;;  %v202_v27 = vld [vmem:[#allocation7 + $0x1c8] sm:$0xff]  ;;  %v201_v31 = vld [vmem:[#allocation7 + $0x1c0] sm:$0xff]  ;;  %v152_v35 = vld [vmem:[#allocation7 + $0x38] sm:$0xff] }
  0x32   :  { %939 = vmatprep.subr.mxu1 %v204_v18  ;;  %906 = vmatprep.subr.mxu0 %v171_v19  ;;  %v186_v29 = vld [vmem:[#allocation7 + $0x148] sm:$0xff]  ;;  %v185_v34 = vld [vmem:[#allocation7 + $0x140] sm:$0xff]  ;;  %v200_v36 = vld [vmem:[#allocation7 + $0x1b8] sm:$0xff] }
  0x33   :  { %940 = vmatpush3.msra.mxu1 %v188_v20  ;;  %907 = vmatpush3.msra.mxu0 %v155_v21  ;;  %v167_v37 = vld [vmem:[#allocation7 + $0xb0] sm:$0xff]  ;;  %v184_v38 = vld [vmem:[#allocation7 + $0x138] sm:$0xff]  ;;  %v166_v43 = vld [vmem:[#allocation7 + $0xa8] sm:$0xff] }
  0x34   :  { %941 = vmatprep.subr.mxu1 %v203_v22  ;;  %908 = vmatprep.subr.mxu0 %v170_v24  ;;  %v151_v39 = vld [vmem:[#allocation7 + $0x30] sm:$0xff]  ;;  %v150_v47 = vld [vmem:[#allocation7 + $0x28] sm:$0xff]  ;;  %v165_v48 = vld [vmem:[#allocation7 + $0xa0] sm:$0xff] }
  0x35   :  { %942 = vmatpush3.msra.mxu1 %v187_v25  ;;  %909 = vmatpush3.msra.mxu0 %v154_v26  ;;  %v199_v40 = vld [vmem:[#allocation7 + $0x1b0] sm:$0xff]  ;;  %v198_v49 = vld [vmem:[#allocation7 + $0x1a8] sm:$0xff]  ;;  %v149_v53 = vld [vmem:[#allocation7 + $0x20] sm:$0xff]  ;;  %v1235_v25 = vmov 1.0  }
  0x36   :  { %943 = vmatprep.subr.mxu1 %v202_v27  ;;  %910 = vmatprep.subr.mxu0 %v169_v28  ;;  %v183_v44 = vld [vmem:[#allocation7 + $0x130] sm:$0xff]  ;;  %v182_v50 = vld [vmem:[#allocation7 + $0x128] sm:$0xff]  ;;  %v197_v54 = vld [vmem:[#allocation7 + $0x1a0] sm:$0xff] }
  0x37   :  { %944 = vmatpush3.msra.mxu1 %v186_v29  ;;  %911 = vmatpush3.msra.mxu0 %v153_v30  ;;  %v1278_v51 = vld [vmem:[#allocation2] sm:$0xff]  ;;  %v1280_v52 = vld [vmem:[#allocation5] sm:$0xff] }
  0x38   :  { %945 = vmatprep.subr.mxu1 %v201_v31  ;;  %912 = vmatprep.subr.mxu0 %v168_v33  ;;  %v57_v55 = vunpack.c.0.s8 %v1278_v51  ;;  %v69_v56 = vrot.slane %v1280_v52, %v68_v41  ;;  %v73_v57 = vrot.slane %v1280_v52, %v72_v42  ;;  %v164_v58 = vld [vmem:[#allocation7 + $0x98] sm:$0xff]  ;;  %v181_v59 = vld [vmem:[#allocation7 + $0x120] sm:$0xff]  ;;  %v58_v60 = vunpack.c.1.s8 %v1278_v51  ;;  %v163_v2 = vld [vmem:[#allocation7 + $0x90] sm:$0xff] }
  0x39   :  { %946 = vmatpush3.msra.mxu1 %v185_v34  ;;  %913 = vmatpush3.msra.mxu0 %v152_v35  ;;  %v77_v61 = vrot.slane %v1280_v52, %v76_v45  ;;  %v81_v62 = vrot.slane %v1280_v52, %v80_v46  ;;  %v148_v63 = vld [vmem:[#allocation7 + $0x18] sm:$0xff]  ;;  %v147_v5 = vld [vmem:[#allocation7 + $0x10] sm:$0xff]  ;;  %v162_v8 = vld [vmem:[#allocation7 + $0x88] sm:$0xff] }
  0x3a   :  { %947 = vmatprep.subr.mxu1 %v200_v36  ;;  %914 = vmatprep.subr.mxu0 %v167_v37  ;;  %v196_v0 = vld [vmem:[#allocation7 + $0x198] sm:$0xff]  ;;  %v118_v1 = vcombine.low %v69_v56, %v73_v57  ;;  %v195_v6 = vld [vmem:[#allocation7 + $0x190] sm:$0xff]  ;;  %v146_v13 = vld [vmem:[#allocation7 + $0x8] sm:$0xff]  ;;  %v84_v56 = vsub.s32 4, %v1272_v32  ;;  %v88_v57 = vsub.s32 5, %v1272_v32 }
  0x3b   :  { %948 = vmatpush3.msra.mxu1 %v184_v38  ;;  %915 = vmatpush3.msra.mxu0 %v151_v39  ;;  %v180_v3 = vld [vmem:[#allocation7 + $0x118] sm:$0xff]  ;;  %v119_v4 = vcombine.low %v77_v61, %v81_v62  ;;  %v179_v9 = vld [vmem:[#allocation7 + $0x110] sm:$0xff]  ;;  %v194_v14 = vld [vmem:[#allocation7 + $0x188] sm:$0xff]  ;;  %v92_v62 = vsub.s32 6, %v1272_v32 }
  0x3c   :  { %949 = vmatprep.subr.mxu1 %v199_v40  ;;  %916 = vmatprep.subr.mxu0 %v166_v43  ;;  %vm1296_vm0 = vcmp.eq.s32.totalorder %v57_v55, %v118_v1  ;;  %v161_v16 = vld [vmem:[#allocation7 + $0x80] sm:$0xff]  ;;  %v178_v19 = vld [vmem:[#allocation7 + $0x108] sm:$0xff]  ;;  %v240_v21 = vld [vmem:[#allocation7 + $0x2f8] sm:$0xff] }
  0x3d   :  { %950 = vmatpush3.msra.mxu1 %v183_v44  ;;  %917 = vmatpush3.msra.mxu0 %v150_v47  ;;  %v881_v11 = vsel %vm1296_vm0, 1.0, %v1234_v10  ;;  %vm1303_vm1 = vcmp.eq.s32.totalorder %v58_v60, %v119_v4  ;;  %v145_v18 = vld [vmem:[#allocation7] sm:$0xff]  ;;  %v224_v24 = vld [vmem:[#allocation7 + $0x278] sm:$0xff]  ;;  %v239_v26 = vld [vmem:[#allocation7 + $0x2f0] sm:$0xff]  ;;  %v85_v4 = vrot.slane %v1280_v52, %v84_v56 }
  0x3e   :  { %951 = vmatprep.subr.mxu1 %v198_v49  ;;  %918 = vmatprep.subr.mxu0 %v165_v48  ;;  %v359_v15 = vcombine.high %v881_v11, %v881_v11  ;;  %v882_v17 = vsel %vm1303_vm1, 1.0, %v1234_v10  ;;  %v193_v20 = vld [vmem:[#allocation7 + $0x180] sm:$0xff]  ;;  %v272_v27 = vld [vmem:[#allocation7 + $0x3f8] sm:$0xff]  ;;  %v223_v28 = vld [vmem:[#allocation7 + $0x270] sm:$0xff]  ;;  %v93_v11 = vrot.slane %v1280_v52, %v92_v62 }
  0x3f   :  { %952 = vmatpush3.msra.mxu1 %v182_v50  ;;  %919 = vmatpush3.msra.mxu0 %v149_v53  ;;  %v177_v22 = vld [vmem:[#allocation7 + $0x100] sm:$0xff]  ;;  %v360_v23 = vcombine.high %v882_v17, %v882_v17  ;;  %v256_v29 = vld [vmem:[#allocation7 + $0x378] sm:$0xff]  ;;  %v238_v30 = vld [vmem:[#allocation7 + $0x2e8] sm:$0xff]  ;;  %v59_v17 = vunpack.c.2.s8 %v1278_v51 }
  0x40   :  { %953 = vmatprep.subr.mxu1 %v197_v54  ;;  %920 = vmatprep.subr.mxu0 %v164_v58  ;;  %v271_v31 = vld [vmem:[#allocation7 + $0x3f0] sm:$0xff]  ;;  %v222_v33 = vld [vmem:[#allocation7 + $0x268] sm:$0xff]  ;;  %v237_v35 = vld [vmem:[#allocation7 + $0x2e0] sm:$0xff] }
  0x41   :  { %954 = vmatpush3.msra.mxu1 %v181_v59  ;;  %921 = vmatpush3.msra.mxu0 %v148_v63  ;;  %v255_v34 = vld [vmem:[#allocation7 + $0x370] sm:$0xff]  ;;  %v270_v36 = vld [vmem:[#allocation7 + $0x3e8] sm:$0xff]  ;;  %v221_v37 = vld [vmem:[#allocation7 + $0x260] sm:$0xff]  ;;  %v96_v63 = vsub.s32 7, %v1272_v32 }
  0x42   :  { %955 = vmatprep.subr.mxu1 %v196_v0  ;;  %922 = vmatprep.subr.mxu0 %v163_v2  ;;  %v254_v38 = vld [vmem:[#allocation7 + $0x368] sm:$0xff]  ;;  %v236_v39 = vld [vmem:[#allocation7 + $0x2d8] sm:$0xff]  ;;  %v269_v40 = vld [vmem:[#allocation7 + $0x3e0] sm:$0xff] }
  0x43   :  { %956 = vmatpush3.msra.mxu1 %v180_v3  ;;  %923 = vmatpush3.msra.mxu0 %v147_v5  ;;  %v220_v43 = vld [vmem:[#allocation7 + $0x258] sm:$0xff]  ;;  %v253_v44 = vld [vmem:[#allocation7 + $0x360] sm:$0xff]  ;;  %v235_v47 = vld [vmem:[#allocation7 + $0x2d0] sm:$0xff]  ;;  %v89_v5 = vrot.slane %v1280_v52, %v88_v57  ;;  %v97_v12 = vrot.slane %v1280_v52, %v96_v63  ;;  %v60_v52 = vunpack.c.3.s8 %v1278_v51 }
  0x44   :  { %957 = vmatprep.subr.mxu1 %v195_v6  ;;  %924 = vmatprep.subr.mxu0 %v162_v8  ;;  %v268_v48 = vld [vmem:[#allocation7 + $0x3d8] sm:$0xff]  ;;  %v219_v49 = vld [vmem:[#allocation7 + $0x250] sm:$0xff]  ;;  %v234_v53 = vld [vmem:[#allocation7 + $0x2c8] sm:$0xff] }
  0x45   :  { %958 = vmatpush3.msra.mxu1 %v179_v9  ;;  %925 = vmatpush3.msra.mxu0 %v146_v13  ;;  %v252_v50 = vld [vmem:[#allocation7 + $0x358] sm:$0xff]  ;;  %v267_v54 = vld [vmem:[#allocation7 + $0x3d0] sm:$0xff]  ;;  %v218_v55 = vld [vmem:[#allocation7 + $0x248] sm:$0xff] }
  0x46   :  { %959 = vmatprep.subr.mxu1 %v194_v14  ;;  %926 = vmatprep.subr.mxu0 %v161_v16  ;;  %v251_v58 = vld [vmem:[#allocation7 + $0x350] sm:$0xff]  ;;  %v233_v59 = vld [vmem:[#allocation7 + $0x2c0] sm:$0xff]  ;;  %v266_v60 = vld [vmem:[#allocation7 + $0x3c8] sm:$0xff] }
  0x47   :  { %438 = vmatprep.mubr.f32.mxu0 %v359_v15  ;;  %927 = vmatpush3.msra.mxu0 %v145_v18  ;;  %v217_v61 = vld [vmem:[#allocation7 + $0x240] sm:$0xff]  ;;  %v250_v0 = vld [vmem:[#allocation7 + $0x348] sm:$0xff]  ;;  %v232_v1 = vld [vmem:[#allocation7 + $0x2b8] sm:$0xff]  ;;  %v120_v18 = vcombine.low %v85_v4, %v89_v5 }
  0x48   :  { %960 = vmatpush3.msra.mxu1 %v178_v19  ;;  %889 = vmatmul.mubr.msk.f32.vlgmr.msra.gmra.mxu0 %vm1296_vm0, %v1235_v25  ;;  %v265_v2 = vld [vmem:[#allocation7 + $0x3c0] sm:$0xff]  ;;  %v216_v3 = vld [vmem:[#allocation7 + $0x238] sm:$0xff]  ;;  %v231_v7 = vld [vmem:[#allocation7 + $0x2b0] sm:$0xff] }
  0x49   :  { %961 = vmatprep.subr.mxu1 %v193_v20  ;;  %966 = vmatprep.subr.mxu0 %v240_v21  ;;  %v249_v6 = vld [vmem:[#allocation7 + $0x340] sm:$0xff]  ;;  %v264_v8 = vld [vmem:[#allocation7 + $0x3b8] sm:$0xff]  ;;  %v215_v9 = vld [vmem:[#allocation7 + $0x230] sm:$0xff]  ;;  %vm1328_vm2 = vcmp.eq.s32.totalorder %v59_v17, %v120_v18 }
  0x4a   :  { %962 = vmatpush3.msra.mxu1 %v177_v22  ;;  %508 = vmatprep.mubr.f32.mxu1 %v360_v23  ;;  %v248_v13 = vld [vmem:[#allocation7 + $0x338] sm:$0xff]  ;;  %v230_v14 = vld [vmem:[#allocation7 + $0x2a8] sm:$0xff]  ;;  %v263_v15 = vld [vmem:[#allocation7 + $0x3b0] sm:$0xff]  ;;  %v121_v23 = vcombine.low %v93_v11, %v97_v12 }
  0x4b   :  { %967 = vmatpush3.msra.mxu0 %v224_v24  ;;  %890 = vmatmul.mubr.msk.f32.vlgmr.msra.gmra.mxu1 %vm1303_vm1, %v1235_v25  ;;  %v214_v16 = vld [vmem:[#allocation7 + $0x228] sm:$0xff]  ;;  %v247_v19 = vld [vmem:[#allocation7 + $0x330] sm:$0xff]  ;;  %v229_v20 = vld [vmem:[#allocation7 + $0x2a0] sm:$0xff] }
  0x4c   :  { %968 = vmatprep.subr.mxu0 %v239_v26  ;;  %1001 = vmatprep.subr.mxu1 %v272_v27  ;;  %v262_v21 = vld [vmem:[#allocation7 + $0x3a8] sm:$0xff]  ;;  %v213_v22 = vld [vmem:[#allocation7 + $0x220] sm:$0xff]  ;;  %v228_v26 = vld [vmem:[#allocation7 + $0x298] sm:$0xff]  ;;  %vm1332_vm3 = vcmp.eq.s32.totalorder %v60_v52, %v121_v23 }
  0x4d   :  { %969 = vmatpush3.msra.mxu0 %v223_v28  ;;  %1002 = vmatpush3.msra.mxu1 %v256_v29  ;;  %v246_v24 = vld [vmem:[#allocation7 + $0x328] sm:$0xff]  ;;  %v261_v27 = vld [vmem:[#allocation7 + $0x3a0] sm:$0xff]  ;;  %v212_v28 = vld [vmem:[#allocation7 + $0x218] sm:$0xff] }
  0x4e   :  { %970 = vmatprep.subr.mxu0 %v238_v30  ;;  %1003 = vmatprep.subr.mxu1 %v271_v31  ;;  %v245_v30 = vld [vmem:[#allocation7 + $0x320] sm:$0xff]  ;;  %v227_v31 = vld [vmem:[#allocation7 + $0x290] sm:$0xff]  ;;  %v260_v51 = vld [vmem:[#allocation7 + $0x398] sm:$0xff] }
  0x4f   :  { %971 = vmatpush3.msra.mxu0 %v222_v33  ;;  %1004 = vmatpush3.msra.mxu1 %v255_v34  ;;  %v211_v33 = vld [vmem:[#allocation7 + $0x210] sm:$0xff]  ;;  %v304_v57 = vld [vmem:[#allocation7 + $0x4f8] sm:$0xff]  ;;  %v286_v4 = vld [vmem:[#allocation7 + $0x468] sm:$0xff] }
  0x50   :  { %972 = vmatprep.subr.mxu0 %v237_v35  ;;  %1005 = vmatprep.subr.mxu1 %v270_v36  ;;  %v244_v35 = vld [vmem:[#allocation7 + $0x318] sm:$0xff]  ;;  %v226_v36 = vld [vmem:[#allocation7 + $0x288] sm:$0xff]  ;;  %v319_v5 = vld [vmem:[#allocation7 + $0x570] sm:$0xff] }
  0x51   :  { %973 = vmatpush3.msra.mxu0 %v221_v37  ;;  %1006 = vmatpush3.msra.mxu1 %v254_v38  ;;  %v883_v37 = vsel %vm1328_vm2, 1.0, %v1234_v10  ;;  %v259_v38 = vld [vmem:[#allocation7 + $0x390] sm:$0xff]  ;;  %v288_v62 = vld [vmem:[#allocation7 + $0x478] sm:$0xff]  ;;  %v333_v12 = vld [vmem:[#allocation7 + $0x5e0] sm:$0xff] }
  0x52   :  { %974 = vmatprep.subr.mxu0 %v236_v39  ;;  %1007 = vmatprep.subr.mxu1 %v269_v40  ;;  %v210_v39 = vld [vmem:[#allocation7 + $0x208] sm:$0xff]  ;;  %v243_v40 = vld [vmem:[#allocation7 + $0x310] sm:$0xff]  ;;  %v300_v11 = vld [vmem:[#allocation7 + $0x4d8] sm:$0xff] }
  0x53   :  { %975 = vmatpush3.msra.mxu0 %v220_v43  ;;  %1008 = vmatpush3.msra.mxu1 %v253_v44  ;;  %v225_v43 = vld [vmem:[#allocation7 + $0x280] sm:$0xff]  ;;  %v884_v44 = vsel %vm1332_vm3, 1.0, %v1234_v10  ;;  %v283_v17 = vld [vmem:[#allocation7 + $0x450] sm:$0xff]  ;;  %v316_v18 = vld [vmem:[#allocation7 + $0x558] sm:$0xff] }
  0x54   :  { %976 = vmatprep.subr.mxu0 %v235_v47  ;;  %1009 = vmatprep.subr.mxu1 %v268_v48  ;;  %v258_v47 = vld [vmem:[#allocation7 + $0x388] sm:$0xff]  ;;  %v209_v48 = vld [vmem:[#allocation7 + $0x200] sm:$0xff]  ;;  %v280_v29 = vld [vmem:[#allocation7 + $0x438] sm:$0xff] }
  0x55   :  { %977 = vmatpush3.msra.mxu0 %v219_v49  ;;  %1010 = vmatpush3.msra.mxu1 %v252_v50  ;;  %v361_v49 = vcombine.high %v883_v37, %v883_v37  ;;  %v242_v50 = vld [vmem:[#allocation7 + $0x308] sm:$0xff]  ;;  %v297_v52 = vld [vmem:[#allocation7 + $0x4c0] sm:$0xff]  ;;  %v279_v34 = vld [vmem:[#allocation7 + $0x430] sm:$0xff] }
  0x56   :  { %978 = vmatprep.subr.mxu0 %v234_v53  ;;  %1011 = vmatprep.subr.mxu1 %v267_v54  ;;  %v257_v53 = vld [vmem:[#allocation7 + $0x380] sm:$0xff]  ;;  %v362_v54 = vcombine.high %v884_v44, %v884_v44  ;;  %v330_v23 = vld [vmem:[#allocation7 + $0x5c8] sm:$0xff]  ;;  %v327_v37 = vld [vmem:[#allocation7 + $0x5b0] sm:$0xff] }
  0x57   :  { %979 = vmatpush3.msra.mxu0 %v218_v55  ;;  %1012 = vmatpush3.msra.mxu1 %v251_v58  ;;  %v1342_v55 = vld [vmem:[#allocation5 + $0x8] sm:$0x1f]  ;;  %v241_v58 = vld [vmem:[#allocation7 + $0x300] sm:$0xff]  ;;  %v326_v44 = vld [vmem:[#allocation7 + $0x5a8] sm:$0xff] }
  0x58   :  { %980 = vmatprep.subr.mxu0 %v233_v59  ;;  %1013 = vmatprep.subr.mxu1 %v266_v60  ;;  %v1347_v59 = vrot.slane %v1342_v55, %v68_v41  ;;  %v1352_v60 = vrot.slane %v1342_v55, %v72_v42  ;;  %v1362_v63 = vrot.slane %v1342_v55, %v80_v46  ;;  %v303_v41 = vld [vmem:[#allocation7 + $0x4f0] sm:$0xff]  ;;  %v320_v46 = vld [vmem:[#allocation7 + $0x578] sm:$0xff] }
  0x59   :  { %981 = vmatpush3.msra.mxu0 %v217_v61  ;;  %1014 = vmatpush3.msra.mxu1 %v250_v0  ;;  %v1357_v61 = vrot.slane %v1342_v55, %v76_v45  ;;  %v336_v45 = vld [vmem:[#allocation7 + $0x5f8] sm:$0xff]  ;;  %v287_v0 = vld [vmem:[#allocation7 + $0x470] sm:$0xff] }
  0x5a   :  { %982 = vmatprep.subr.mxu0 %v232_v1  ;;  %1015 = vmatprep.subr.mxu1 %v265_v2  ;;  %v122_v42 = vcombine.low %v1347_v59, %v1352_v60  ;;  %v302_v2 = vld [vmem:[#allocation7 + $0x4e8] sm:$0xff] }
  0x5b   :  { %983 = vmatpush3.msra.mxu0 %v216_v3  ;;  %1016 = vmatpush3.msra.mxu1 %v249_v6  ;;  %v123_v1 = vcombine.low %v1357_v61, %v1362_v63  ;;  %v335_v3 = vld [vmem:[#allocation7 + $0x5f0] sm:$0xff]  ;;  %v301_v6 = vld [vmem:[#allocation7 + $0x4e0] sm:$0xff]  ;;  %v306_v63 = vld [vmem:[#allocation7 + $0x508] sm:$0xff] }
  0x5c   :  { %984 = vmatprep.subr.mxu0 %v231_v7  ;;  %1017 = vmatprep.subr.mxu1 %v264_v8  ;;  %v334_v7 = vld [vmem:[#allocation7 + $0x5e8] sm:$0xff]  ;;  %v285_v8 = vld [vmem:[#allocation7 + $0x460] sm:$0xff] }
  0x5d   :  { %985 = vmatpush3.msra.mxu0 %v215_v9  ;;  %1018 = vmatpush3.msra.mxu1 %v248_v13  ;;  %v318_v9 = vld [vmem:[#allocation7 + $0x568] sm:$0xff]  ;;  %v284_v13 = vld [vmem:[#allocation7 + $0x458] sm:$0xff] }
  0x5e   :  { %986 = vmatprep.subr.mxu0 %v230_v14  ;;  %1019 = vmatprep.subr.mxu1 %v263_v15  ;;  %v317_v14 = vld [vmem:[#allocation7 + $0x560] sm:$0xff]  ;;  %v299_v15 = vld [vmem:[#allocation7 + $0x4d0] sm:$0xff] }
  0x5f   :  { %987 = vmatpush3.msra.mxu0 %v214_v16  ;;  %1020 = vmatpush3.msra.mxu1 %v247_v19  ;;  %v332_v16 = vld [vmem:[#allocation7 + $0x5d8] sm:$0xff]  ;;  %v298_v19 = vld [vmem:[#allocation7 + $0x4c8] sm:$0xff] }
  0x60   :  { %988 = vmatprep.subr.mxu0 %v229_v20  ;;  %1021 = vmatprep.subr.mxu1 %v262_v21  ;;  %v331_v20 = vld [vmem:[#allocation7 + $0x5d0] sm:$0xff]  ;;  %v282_v21 = vld [vmem:[#allocation7 + $0x448] sm:$0xff] }
  0x61   :  { %989 = vmatpush3.msra.mxu0 %v213_v22  ;;  %1022 = vmatpush3.msra.mxu1 %v246_v24  ;;  %v315_v22 = vld [vmem:[#allocation7 + $0x550] sm:$0xff]  ;;  %v281_v24 = vld [vmem:[#allocation7 + $0x440] sm:$0xff] }
  0x62   :  { %990 = vmatprep.subr.mxu0 %v228_v26  ;;  %1023 = vmatprep.subr.mxu1 %v261_v27  ;;  %v314_v26 = vld [vmem:[#allocation7 + $0x548] sm:$0xff]  ;;  %v296_v27 = vld [vmem:[#allocation7 + $0x4b8] sm:$0xff] }
  0x63   :  { %991 = vmatpush3.msra.mxu0 %v212_v28  ;;  %1024 = vmatpush3.msra.mxu1 %v245_v30  ;;  %v329_v28 = vld [vmem:[#allocation7 + $0x5c0] sm:$0xff] }
  0x64   :  { %992 = vmatprep.subr.mxu0 %v227_v31  ;;  %1025 = vmatprep.subr.mxu1 %v260_v51  ;;  %v313_v30 = vld [vmem:[#allocation7 + $0x540] sm:$0xff]  ;;  %v295_v31 = vld [vmem:[#allocation7 + $0x4b0] sm:$0xff] }
  0x65   :  { %993 = vmatpush3.msra.mxu0 %v211_v33  ;;  %1026 = vmatpush3.msra.mxu1 %v244_v35  ;;  %v1374_v51 = vld [vmem:[#allocation2 + $0x8] sm:$0x1f]  ;;  %v328_v33 = vld [vmem:[#allocation7 + $0x5b8] sm:$0xff] }
  0x66   :  { %994 = vmatprep.subr.mxu0 %v226_v36  ;;  %1027 = vmatprep.subr.mxu1 %v259_v38  ;;  %v312_v35 = vld [vmem:[#allocation7 + $0x538] sm:$0xff]  ;;  %v294_v36 = vld [vmem:[#allocation7 + $0x4a8] sm:$0xff] }
  0x67   :  { %995 = vmatpush3.msra.mxu0 %v210_v39  ;;  %1028 = vmatpush3.msra.mxu1 %v243_v40  ;;  %v278_v38 = vld [vmem:[#allocation7 + $0x428] sm:$0xff]  ;;  %v61_v39 = vunpack.c.0.s8 %v1374_v51  ;;  %v311_v40 = vld [vmem:[#allocation7 + $0x530] sm:$0xff] }
  0x68   :  { %996 = vmatprep.subr.mxu0 %v225_v43  ;;  %1029 = vmatprep.subr.mxu1 %v258_v47  ;;  %v293_v43 = vld [vmem:[#allocation7 + $0x4a0] sm:$0xff] }
  0x69   :  { %997 = vmatpush3.msra.mxu0 %v209_v48  ;;  %578 = vmatprep.mubr.f32.mxu0 %v361_v49  ;;  %v277_v47 = vld [vmem:[#allocation7 + $0x420] sm:$0xff]  ;;  %v310_v48 = vld [vmem:[#allocation7 + $0x528] sm:$0xff]  ;;  %v292_v49 = vld [vmem:[#allocation7 + $0x498] sm:$0xff]  ;;  %vm1381_vm4 = vcmp.eq.s32.totalorder %v61_v39, %v122_v42 }
  0x6a   :  { %1030 = vmatpush3.msra.mxu1 %v242_v50  ;;  %891 = vmatmul.mubr.msk.f32.vlgmr.msra.gmra.mxu0 %vm1328_vm2, %v1235_v25  ;;  %v62_v50 = vunpack.c.1.s8 %v1374_v51  ;;  %v885_v59 = vsel %vm1381_vm4, 1.0, %v1234_v10  ;;  %v323_v42 = vld [vmem:[#allocation7 + $0x590] sm:$0xff] }
  0x6b   :  { %1031 = vmatprep.subr.mxu1 %v257_v53  ;;  %1036 = vmatprep.subr.mxu0 %v304_v57  ;;  %v325_v53 = vld [vmem:[#allocation7 + $0x5a0] sm:$0xff] }
  0x6c   :  { %1032 = vmatpush3.msra.mxu1 %v241_v58  ;;  %648 = vmatprep.mubr.f32.mxu1 %v362_v54  ;;  %v276_v54 = vld [vmem:[#allocation7 + $0x418] sm:$0xff]  ;;  %v309_v58 = vld [vmem:[#allocation7 + $0x520] sm:$0xff]  ;;  %vm1391_vm5 = vcmp.eq.s32.totalorder %v62_v50, %v123_v1 }
  0x6d   :  { %1037 = vmatpush3.msra.mxu0 %v288_v62  ;;  %892 = vmatmul.mubr.msk.f32.vlgmr.msra.gmra.mxu1 %vm1332_vm3, %v1235_v25  ;;  %v291_v62 = vld [vmem:[#allocation7 + $0x490] sm:$0xff]  ;;  %v886_v61 = vsel %vm1391_vm5, 1.0, %v1234_v10  ;;  %v321_v1 = vld [vmem:[#allocation7 + $0x580] sm:$0xff] }
  0x6e   :  { %1038 = vmatprep.subr.mxu0 %v303_v41  ;;  %1071 = vmatprep.subr.mxu1 %v336_v45  ;;  %v324_v41 = vld [vmem:[#allocation7 + $0x598] sm:$0xff]  ;;  %v275_v45 = vld [vmem:[#allocation7 + $0x410] sm:$0xff] }
  0x6f   :  { %1039 = vmatpush3.msra.mxu0 %v287_v0  ;;  %1072 = vmatpush3.msra.mxu1 %v320_v46  ;;  %v308_v0 = vld [vmem:[#allocation7 + $0x518] sm:$0xff]  ;;  %v290_v46 = vld [vmem:[#allocation7 + $0x488] sm:$0xff] }
  0x70   :  { %1040 = vmatprep.subr.mxu0 %v302_v2  ;;  %1073 = vmatprep.subr.mxu1 %v335_v3  ;;  %v274_v2 = vld [vmem:[#allocation7 + $0x408] sm:$0xff]  ;;  %v307_v3 = vld [vmem:[#allocation7 + $0x510] sm:$0xff] }
  0x71   :  { %1041 = vmatpush3.msra.mxu0 %v286_v4  ;;  %1074 = vmatpush3.msra.mxu1 %v319_v5  ;;  %v289_v4 = vld [vmem:[#allocation7 + $0x480] sm:$0xff]  ;;  %v322_v5 = vld [vmem:[#allocation7 + $0x588] sm:$0xff] }
  0x72   :  { %1042 = vmatprep.subr.mxu0 %v301_v6  ;;  %1075 = vmatprep.subr.mxu1 %v334_v7  ;;  %v273_v6 = vld [vmem:[#allocation7 + $0x400] sm:$0xff]  ;;  %v363_v7 = vcombine.high %v885_v59, %v885_v59 }
  0x73   :  { %1043 = vmatpush3.msra.mxu0 %v285_v8  ;;  %1076 = vmatpush3.msra.mxu1 %v318_v9  ;;  %v305_v8 = vld [vmem:[#allocation7 + $0x500] sm:$0xff]  ;;  %v364_v9 = vcombine.high %v886_v61, %v886_v61 }
  0x74   :  { %1044 = vmatprep.subr.mxu0 %v300_v11  ;;  %1077 = vmatprep.subr.mxu1 %v333_v12  ;;  %v344_v11 = vld [vmem:[#allocation7 + $0x638] sm:$0xff]  ;;  %v343_v12 = vld [vmem:[#allocation7 + $0x630] sm:$0xff] }
  0x75   :  { %1045 = vmatpush3.msra.mxu0 %v284_v13  ;;  %1078 = vmatpush3.msra.mxu1 %v317_v14  ;;  %v342_v13 = vld [vmem:[#allocation7 + $0x628] sm:$0xff]  ;;  %v341_v14 = vld [vmem:[#allocation7 + $0x620] sm:$0xff] }
  0x76   :  { %1046 = vmatprep.subr.mxu0 %v299_v15  ;;  %1079 = vmatprep.subr.mxu1 %v332_v16  ;;  %v340_v15 = vld [vmem:[#allocation7 + $0x618] sm:$0xff]  ;;  %v63_v16 = vunpack.c.2.s8 %v1374_v51 }
  0x77   :  { %1047 = vmatpush3.msra.mxu0 %v283_v17  ;;  %1080 = vmatpush3.msra.mxu1 %v316_v18  ;;  %v339_v17 = vld [vmem:[#allocation7 + $0x610] sm:$0xff]  ;;  %v338_v18 = vld [vmem:[#allocation7 + $0x608] sm:$0xff] }
  0x78   :  { %1048 = vmatprep.subr.mxu0 %v298_v19  ;;  %1081 = vmatprep.subr.mxu1 %v331_v20  ;;  %v337_v19 = vld [vmem:[#allocation7 + $0x600] sm:$0xff] }
  0x79   :  { %1049 = vmatpush3.msra.mxu0 %v282_v21  ;;  %1082 = vmatpush3.msra.mxu1 %v315_v22 }
  0x7a   :  { %1050 = vmatprep.subr.mxu0 %v297_v52  ;;  %1083 = vmatprep.subr.mxu1 %v330_v23  ;;  %v888_v52 = vld [vmem:[%s1427_s3] ss:$0 sm:$0xff]  ;;  %s871_s3 = sshll.u32 %s1237_s7, 4  ;;  %s872_s3 = int_to_ptr.vmem [resolvable:$true] %s871_s3 }
  0x7b   :  { %1051 = vmatpush3.msra.mxu0 %v281_v24  ;;  %1084 = vmatpush3.msra.mxu1 %v314_v26  ;;  %s1203_s8 = scalar_lea.vmem %s872_s3, 32  ;;  %p1208_p2 = scmp.lt.s32.totalorder %s872_s3, %s872_s3 }
  0x7c   :  { %1052 = vmatprep.subr.mxu0 %v296_v27  ;;  %1085 = vmatprep.subr.mxu1 %v329_v28  ;;  %p1204_p1 = scmp.ne.s32.totalorder %s872_s3, %s1203_s8  ;;  %p1209_p3 = scmp.lt.s32.totalorder %s1203_s8, %s1203_s8 }
  0x7d   :  { %1053 = vmatpush3.msra.mxu0 %v280_v29  ;;  %1086 = vmatpush3.msra.mxu1 %v313_v30 }
  0x7e   :  { %1054 = vmatprep.subr.mxu0 %v295_v31  ;;  %1087 = vmatprep.subr.mxu1 %v328_v33  ;;  %p1210_p4 = por %p1209_p3, %p1208_p2 }
  0x7f   :  { %1055 = vmatpush3.msra.mxu0 %v279_v34  ;;  %1088 = vmatpush3.msra.mxu1 %v312_v35 }
  0x80   :  { %1056 = vmatprep.subr.mxu0 %v294_v36  ;;  %1089 = vmatprep.subr.mxu1 %v327_v37  ;;  %p1211_p5 = pnand %p1210_p4, %p1204_p1 }
  0x81   :  { %1057 = vmatpush3.msra.mxu0 %v278_v38  ;;  %1090 = vmatpush3.msra.mxu1 %v311_v40 }
  0x82   :  { %1058 = vmatprep.subr.mxu0 %v293_v43  ;;  %1091 = vmatprep.subr.mxu1 %v326_v44 }
  0x83   :  { %1059 = vmatpush3.msra.mxu0 %v277_v47  ;;  %1092 = vmatpush3.msra.mxu1 %v310_v48 }
  0x84   :  { %1060 = vmatprep.subr.mxu0 %v292_v49  ;;  %1093 = vmatprep.subr.mxu1 %v325_v53 }
  0x85   :  { %1061 = vmatpush3.msra.mxu0 %v276_v54  ;;  %1094 = vmatpush3.msra.mxu1 %v309_v58 }
  0x86   :  { %1062 = vmatprep.subr.mxu0 %v291_v62  ;;  %1095 = vmatprep.subr.mxu1 %v324_v41 }
  0x87   :  { %1063 = vmatpush3.msra.mxu0 %v275_v45  ;;  %1096 = vmatpush3.msra.mxu1 %v308_v0 }
  0x88   :  { %1064 = vmatprep.subr.mxu0 %v290_v46  ;;  %1097 = vmatprep.subr.mxu1 %v323_v42 }
  0x89   :  { %1065 = vmatpush3.msra.mxu0 %v274_v2  ;;  %1098 = vmatpush3.msra.mxu1 %v307_v3 }
  0x8a   :  { %1066 = vmatprep.subr.mxu0 %v289_v4  ;;  %1099 = vmatprep.subr.mxu1 %v322_v5 }
  0x8b   :  { %1067 = vmatpush3.msra.mxu0 %v273_v6  ;;  %718 = vmatprep.mubr.f32.mxu0 %v363_v7 }
  0x8c   :  { %1100 = vmatpush3.msra.mxu1 %v306_v63  ;;  %893 = vmatmul.mubr.msk.f32.vlgmr.msra.gmra.mxu0 %vm1381_vm4, %v1235_v25 }
  0x8d   :  { %1101 = vmatprep.subr.mxu1 %v321_v1  ;;  %1115 = vmatprep.subr.mxu0 %v1234_v10 }
  0x8e   :  { %1102 = vmatpush3.msra.mxu1 %v305_v8  ;;  %788 = vmatprep.mubr.f32.mxu1 %v364_v9 }
  0x8f   :  { %1116 = vmatpush3.msra.mxu0 %v344_v11  ;;  %894 = vmatmul.mubr.msk.f32.vlgmr.msra.gmra.mxu1 %vm1391_vm5, %v1235_v25  ;;  %v117_v25 = vrot.slane %v1342_v55, %v84_v56 }
  0x90   :  { %1117 = vmatprep.subr.mxu0 %v1234_v10  ;;  %1131 = vmatprep.mubr.msk.f32.mxu0 %vm1236_vm6, %v1234_v10 }
  0x91   :  { %1118 = vmatpush3.msra.mxu0 %v343_v12  ;;  %vm130_vm7 = vcmp.eq.s32.totalorder %v63_v16, %v117_v25 }
  0x92   :  { %1119 = vmatprep.subr.mxu0 %v1234_v10  ;;  %v887_v20 = vsel %vm130_vm7, 1.0, %v1234_v10 }
  0x93   :  { %1120 = vmatpush3.msra.mxu0 %v342_v13 }
  0x94   :  { %1121 = vmatprep.subr.mxu0 %v1234_v10 }
  0x95   :  { %1122 = vmatpush3.msra.mxu0 %v341_v14 }
  0x96   :  { %1123 = vmatprep.subr.mxu0 %v1234_v10 }
  0x97   :  { %1124 = vmatpush3.msra.mxu0 %v340_v15 }
  0x98   :  { %1125 = vmatprep.subr.mxu0 %v1234_v10 }
  0x99   :  { %1126 = vmatpush3.msra.mxu0 %v339_v17 }
  0x9a   :  { %1127 = vmatprep.subr.mxu0 %v1234_v10 }
  0x9b   :  { %1128 = vmatpush3.msra.mxu0 %v338_v18 }
  0x9c   :  { %1129 = vmatprep.subr.mxu0 %v1234_v10 }
  0x9d   :  { %1130 = vmatpush3.msra.mxu0 %v337_v19 }
  0x9e   :  { %1132 = vmatmul.mubr.msk.f32.vlgmr.msra.gmra.mxu0 %vm371_vm8, %v887_v20 }
 0x108   :  { %v928_v32 = vpop.f32.mrf.mxu0 }
 0x10a   :  { %v929_v56 = vpop.f32.mrf.mxu0 }
 0x10b   :  { %v963_v55 = vpop.f32.mrf.mxu1  ;;  %v930_v22 = vadd.f32 %v929_v56, %v928_v32 }
 0x10d   :  { %v964_v23 = vpop.f32.mrf.mxu1  ;;  %v441_v27 = vadd.f32 %v930_v22, %v888_v52 }
 0x10e   :  { %v965_v28 = vadd.f32 %v964_v23, %v963_v55 }
 0x110   :  { %v511_v10 = vadd.f32 %v965_v28, %v441_v27 }
 0x12a   :  { %v998_v21 = vpop.f32.mrf.mxu0 }
 0x12c   :  { %v999_v24 = vpop.f32.mrf.mxu0 }
 0x12d   :  { %v1033_v26 = vpop.f32.mrf.mxu1  ;;  %v1000_v30 = vadd.f32 %v999_v24, %v998_v21 }
 0x12f   :  { %v1034_v31 = vpop.f32.mrf.mxu1  ;;  %v581_v34 = vadd.f32 %v1000_v30, %v511_v10 }
 0x130   :  { %v1035_v35 = vadd.f32 %v1034_v31, %v1033_v26 }
 0x132   :  { %v651_v38 = vadd.f32 %v1035_v35, %v581_v34 }
 0x14c   :  { %v1068_v29 = vpop.f32.mrf.mxu0 }
 0x14e   :  { %v1069_v51 = vpop.f32.mrf.mxu0 }
 0x14f   :  { %v1103_v33 = vpop.f32.mrf.mxu1  ;;  %v1070_v36 = vadd.f32 %v1069_v51, %v1068_v29 }
 0x151   :  { %v1104_v37 = vpop.f32.mrf.mxu1  ;;  %v721_v39 = vadd.f32 %v1070_v36, %v651_v38 }
 0x152   :  { %v1105_v40 = vadd.f32 %v1104_v37, %v1103_v33 }
 0x154   :  { %v791_v43 = vadd.f32 %v1105_v40, %v721_v39 }
 0x15e   :  { %v860_v44 = vpop.f32.mrf.mxu0 }
 0x15f   :  { %v861_v47 = vadd.f32 %v860_v44, %v791_v43 }
 0x160   :  { %v1133_v48 = vpop.f32.mrf.mxu0 }
 0x161   :  { %864 = vst [vmem:[#allocation8] sm:$0x3] %v861_v47 }
 0x162   :  { %1214 = shalt.err (!%p1211_p5)
}
 0x163   :  { %874 = dma.vmem_to_hbm [thread:$0]  %s872_s3, 32, %s1428_s4, [#allocation4]  }
 0x164   :  { %1227 = dma.done.wait [#allocation4], 32  }
 0x165   :  { %1228 = vsyncadd [#allocation4], 4294967264 }
 0x166   :  { %878 = vsyncpa [#allocation3], 1 }
 0x167   :  { %879 = vsyncpa [#allocation6], 1 }
 0x168   :  { %880 = vsyncpa [#allocation4], 1 }

</bundles_post_ra>
